<compile_context>
chip_gen: v7x
topology: tpu7x:2x2x1
jax: 0.10.0
libtpu: 0.0.40
codegen_flags: <defaults>
</compile_context>

<pallas_src>
import jax
import jax.numpy as jnp
from jax.experimental import pallas as pl
from jax.experimental.pallas import tpu as pltpu

H1 = 128      # first hidden width   (nn.Linear(ndim, 128))
H2 = 64       # second hidden width  (nn.Linear(128, 64))
MAX_TB = 512  # max batch-tile rows (MXU-saturating, tiny VMEM footprint)


def _round_up(n, m):
    return ((n + m - 1) // m) * m


def _mlp_kernel(x_ref, w1_ref, b1_ref, w2_ref, b2_ref, w3_ref, b3_ref, o_ref):
    # Layer 1: (TB, ndim) @ (ndim, 128), bf16 operands, f32 accumulate.
    h1 = jnp.dot(x_ref[...], w1_ref[...], preferred_element_type=jnp.float32)
    h1 = jnp.maximum(h1 + b1_ref[...], 0.0)
    # Layer 2: (TB, 128) @ (128, 64), bf16 operands, f32 accumulate.
    h2 = jnp.dot(h1.astype(jnp.bfloat16), w2_ref[...],
                 preferred_element_type=jnp.float32)
    h2 = jnp.maximum(h2 + b2_ref[...], 0.0)
    # Layer 3: logits written un-padded as (TB, n_actions) f32.
    o_ref[...] = (
        jnp.dot(h2.astype(jnp.bfloat16), w3_ref[...],
                preferred_element_type=jnp.float32)
        + b3_ref[...]
    )


def prepare_pg_params(w1, b1, w2, b2, w3, b3):
    """One-time parameter prep: bf16 weights (MXU-native), f32 row-vector biases."""
    return (
        w1.astype(jnp.bfloat16), b1.astype(jnp.float32).reshape(1, -1),
        w2.astype(jnp.bfloat16), b2.astype(jnp.float32).reshape(1, -1),
        w3.astype(jnp.bfloat16), b3.astype(jnp.float32).reshape(1, -1),
    )


@jax.jit
def pg_forward(x, w1, b1, w2, b2, w3, b3):
    """Forward pass of PG.model.  x: (B, ndim) -> (B, n_actions) float32 logits."""
    B, ndim = x.shape
    n_actions = w3.shape[-1]

    # No-ops when params came from prepare_pg_params(); otherwise fused in-jit.
    w1 = w1.astype(jnp.bfloat16)
    w2 = w2.astype(jnp.bfloat16)
    w3 = w3.astype(jnp.bfloat16)
    b1 = b1.astype(jnp.float32).reshape(1, H1)
    b2 = b2.astype(jnp.float32).reshape(1, H2)
    b3 = b3.astype(jnp.float32).reshape(1, n_actions)

    xb = x.astype(jnp.bfloat16)

    # Batch tiling: one full-array tile for small batches, 512-row tiles
    # (grid >= 2, "parallel" -> both TCs on v7x) for large ones.
    TB = min(MAX_TB, _round_up(B, 8))
    Bp = _round_up(B, TB)
    if Bp != B:
        xb = jnp.zeros((Bp, ndim), jnp.bfloat16).at[:B].set(xb)

    grid = (Bp // TB,)

    out = pl.pallas_call(
        _mlp_kernel,
        out_shape=jax.ShapeDtypeStruct((Bp, n_actions), jnp.float32),
        grid_spec=pltpu.PrefetchScalarGridSpec(
            num_scalar_prefetch=0,
            grid=grid,
            in_specs=[
                pl.BlockSpec((TB, ndim), lambda i: (i, 0)),       # x tile
                pl.BlockSpec((ndim, H1), lambda i: (0, 0)),       # W1 (resident)
                pl.BlockSpec((1, H1), lambda i: (0, 0)),          # b1
                pl.BlockSpec((H1, H2), lambda i: (0, 0)),         # W2
                pl.BlockSpec((1, H2), lambda i: (0, 0)),          # b2
                pl.BlockSpec((H2, n_actions), lambda i: (0, 0)),  # W3
                pl.BlockSpec((1, n_actions), lambda i: (0, 0)),   # b3
            ],
            out_specs=pl.BlockSpec((TB, n_actions), lambda i: (i, 0)),
        ),
        compiler_params=pltpu.CompilerParams(
            dimension_semantics=("parallel",),
        ),
    )(xb, w1, b1, w2, b2, w3, b3)

    return out[:B]


def init_pg_params(key, ndim, n_actions):
    """Mimics PyTorch nn.Linear default init: U(-1/sqrt(fan_in), +1/sqrt(fan_in))."""
    def linear_init(k, fan_in, fan_out):
        kw, kb = jax.random.split(k)
        bound = 1.0 / jnp.sqrt(fan_in)
        w = jax.random.uniform(kw, (fan_in, fan_out), jnp.float32, -bound, bound)
        b = jax.random.uniform(kb, (fan_out,), jnp.float32, -bound, bound)
        return w, b

    k1, k2, k3 = jax.random.split(key, 3)
    w1, b1 = linear_init(k1, ndim, H1)
    w2, b2 = linear_init(k2, H1, H2)
    w3, b3 = linear_init(k3, H2, n_actions)
    return w1, b1, w2, b2, w3, b3


def _reference_f32(x, w1, b1, w2, b2, w3, b3):
    """Exact f32 semantics of the PyTorch module."""
    x = x.astype(jnp.float32)
    h1 = jnp.maximum(x @ w1 + b1, 0.0)
    h2 = jnp.maximum(h1 @ w2 + b2, 0.0)
    return h2 @ w3 + b3


def _reference_mixed(x, w1, b1, w2, b2, w3, b3):
    """Same mixed-precision recipe the kernel uses (bf16 operands, f32 accum)."""
    xb = x.astype(jnp.bfloat16)
    w1b, w2b, w3b = (w.astype(jnp.bfloat16) for w in (w1, w2, w3))
    h1 = jnp.maximum(
        jnp.dot(xb, w1b, preferred_element_type=jnp.float32) + b1, 0.0)
    h2 = jnp.maximum(
        jnp.dot(h1.astype(jnp.bfloat16), w2b,
                preferred_element_type=jnp.float32) + b2, 0.0)
    return jnp.dot(h2.astype(jnp.bfloat16), w3b,
                   preferred_element_type=jnp.float32) + b3


if __name__ == "__main__":
    ndim = 4          # state dimension
    n_actions = 3     # number of actions

    key = jax.random.PRNGKey(0)
    kx1, kx2, kp = jax.random.split(key, 3)

    params = init_pg_params(kp, ndim, n_actions)
    prepared = prepare_pg_params(*params)   # one-time bf16 cast / bias reshape

    # Small batch: single full-array tile.
    x_small = jax.random.normal(kx1, (8, ndim), jnp.float32)
    logits_small = jax.block_until_ready(pg_forward(x_small, *prepared))
    assert logits_small.shape == (8, n_actions)
    assert jnp.allclose(logits_small, _reference_mixed(x_small, *params),
                        atol=2e-3, rtol=2e-3), "mismatch vs mixed-precision ref"
    assert jnp.allclose(logits_small, _reference_f32(x_small, *params),
                        atol=5e-2, rtol=5e-2), "mismatch vs f32 reference"

    # Larger batch: exercises 512-row tiling, multi-step grid, batch padding.
    x_big = jax.random.normal(kx2, (520, ndim), jnp.float32)
    logits_big = jax.block_until_ready(pg_forward(x_big, *prepared))
    assert logits_big.shape == (520, n_actions)
    assert jnp.allclose(logits_big, _reference_mixed(x_big, *params),
                        atol=2e-3, rtol=2e-3), "mismatch vs mixed-precision ref"
    assert jnp.allclose(logits_big, _reference_f32(x_big, *params),
                        atol=5e-2, rtol=5e-2), "mismatch vs f32 reference"

    print("KERNEL_OK")
</pallas_src>

<mosaic_0001>
module attributes {stable_mosaic.version = 11 : i64} {
  func.func @_mlp_kernel(%arg0: i32, %arg1: memref<8x4xbf16, #tpu.memory_space<vmem>>, %arg2: memref<4x128xbf16, #tpu.memory_space<vmem>>, %arg3: memref<1x128xf32, #tpu.memory_space<vmem>>, %arg4: memref<128x64xbf16, #tpu.memory_space<vmem>>, %arg5: memref<1x64xf32, #tpu.memory_space<vmem>>, %arg6: memref<64x3xbf16, #tpu.memory_space<vmem>>, %arg7: memref<1x3xf32, #tpu.memory_space<vmem>>, %arg8: memref<8x3xf32, #tpu.memory_space<vmem>>) attributes {dimension_semantics = [#tpu.dimension_semantics<parallel>], iteration_bounds = array<i64: 1>, scalar_prefetch = 0 : i64, scratch_operands = 0 : i64, tpu.core_type = #tpu.core_type<tc>, window_params = [{transform_indices = @transform_0, window_bounds = array<i64: 8, 4>}, {pipeline_mode = #tpu.pipeline_mode<synchronous>, transform_indices = @transform_1, window_bounds = array<i64: 4, 128>}, {pipeline_mode = #tpu.pipeline_mode<synchronous>, transform_indices = @transform_2, window_bounds = array<i64: 1, 128>}, {pipeline_mode = #tpu.pipeline_mode<synchronous>, transform_indices = @transform_3, window_bounds = array<i64: 128, 64>}, {pipeline_mode = #tpu.pipeline_mode<synchronous>, transform_indices = @transform_4, window_bounds = array<i64: 1, 64>}, {pipeline_mode = #tpu.pipeline_mode<synchronous>, transform_indices = @transform_5, window_bounds = array<i64: 64, 3>}, {pipeline_mode = #tpu.pipeline_mode<synchronous>, transform_indices = @transform_6, window_bounds = array<i64: 1, 3>}, {transform_indices = @transform_7, window_bounds = array<i64: 8, 3>}]} {
    %c0 = arith.constant 0 : index
    %c0_0 = arith.constant 0 : index
    %0 = vector.load %arg1[%c0, %c0_0] : memref<8x4xbf16, #tpu.memory_space<vmem>>, vector<8x4xbf16>
    %c0_1 = arith.constant 0 : index
    %c0_2 = arith.constant 0 : index
    %1 = vector.load %arg2[%c0_1, %c0_2] : memref<4x128xbf16, #tpu.memory_space<vmem>>, vector<4x128xbf16>
    %cst = arith.constant dense<0.000000e+00> : vector<8x128xf32>
    %2 = tpu.matmul %0, %1, %cst {dimension_numbers = #tpu.dot_dimension_numbers<[1], [0], [0], [1], [0, 0, 1, 1], [], []>} : vector<8x4xbf16>, vector<4x128xbf16>, vector<8x128xf32> -> vector<8x128xf32>
    %c0_3 = arith.constant 0 : index
    %c0_4 = arith.constant 0 : index
    %3 = vector.load %arg3[%c0_3, %c0_4] : memref<1x128xf32, #tpu.memory_space<vmem>>, vector<1x128xf32>
    %4 = vector.broadcast %3 : vector<1x128xf32> to vector<8x128xf32>
    %5 = arith.addf %2, %4 : vector<8x128xf32>
    %cst_5 = arith.constant 0.000000e+00 : f32
    %6 = vector.broadcast %cst_5 : f32 to vector<8x128xf32>
    %7 = arith.maximumf %5, %6 : vector<8x128xf32>
    %8 = arith.truncf %7 : vector<8x128xf32> to vector<8x128xbf16>
    %c0_6 = arith.constant 0 : index
    %c0_7 = arith.constant 0 : index
    %9 = vector.load %arg4[%c0_6, %c0_7] : memref<128x64xbf16, #tpu.memory_space<vmem>>, vector<128x64xbf16>
    %cst_8 = arith.constant dense<0.000000e+00> : vector<8x64xf32>
    %10 = tpu.matmul %8, %9, %cst_8 {dimension_numbers = #tpu.dot_dimension_numbers<[1], [0], [0], [1], [0, 0, 1, 1], [], []>} : vector<8x128xbf16>, vector<128x64xbf16>, vector<8x64xf32> -> vector<8x64xf32>
    %c0_9 = arith.constant 0 : index
    %c0_10 = arith.constant 0 : index
    %11 = vector.load %arg5[%c0_9, %c0_10] : memref<1x64xf32, #tpu.memory_space<vmem>>, vector<1x64xf32>
    %12 = vector.broadcast %11 : vector<1x64xf32> to vector<8x64xf32>
    %13 = arith.addf %10, %12 : vector<8x64xf32>
    %cst_11 = arith.constant 0.000000e+00 : f32
    %14 = vector.broadcast %cst_11 : f32 to vector<8x64xf32>
    %15 = arith.maximumf %13, %14 : vector<8x64xf32>
    %16 = arith.truncf %15 : vector<8x64xf32> to vector<8x64xbf16>
    %c0_12 = arith.constant 0 : index
    %c0_13 = arith.constant 0 : index
    %17 = vector.load %arg6[%c0_12, %c0_13] : memref<64x3xbf16, #tpu.memory_space<vmem>>, vector<64x3xbf16>
    %cst_14 = arith.constant dense<0.000000e+00> : vector<8x3xf32>
    %18 = tpu.matmul %16, %17, %cst_14 {dimension_numbers = #tpu.dot_dimension_numbers<[1], [0], [0], [1], [0, 0, 1, 1], [], []>} : vector<8x64xbf16>, vector<64x3xbf16>, vector<8x3xf32> -> vector<8x3xf32>
    %c0_15 = arith.constant 0 : index
    %c0_16 = arith.constant 0 : index
    %19 = vector.load %arg7[%c0_15, %c0_16] : memref<1x3xf32, #tpu.memory_space<vmem>>, vector<1x3xf32>
    %20 = vector.broadcast %19 : vector<1x3xf32> to vector<8x3xf32>
    %21 = arith.addf %18, %20 : vector<8x3xf32>
    %c0_17 = arith.constant 0 : index
    %c0_18 = arith.constant 0 : index
    %22 = vector.load %arg8[%c0_17, %c0_18] : memref<8x3xf32, #tpu.memory_space<vmem>>, vector<8x3xf32>
    tpu.vector_store %arg8[%c0_17, %c0_18], %21 {strides = array<i32>} : memref<8x3xf32, #tpu.memory_space<vmem>>, vector<8x3xf32>,
    return
  }
  func.func @transform_0(%arg0: i32) -> (i32, i32) {
    %c0_i32 = arith.constant 0 : i32
    %c0_i32_0 = arith.constant 0 : i32
    return %arg0, %c0_i32 : i32, i32
  }
  func.func @transform_1(%arg0: i32) -> (i32, i32) {
    %c0_i32 = arith.constant 0 : i32
    %c0_i32_0 = arith.constant 0 : i32
    %c0_i32_1 = arith.constant 0 : i32
    return %c0_i32, %c0_i32_0 : i32, i32
  }
  func.func @transform_2(%arg0: i32) -> (i32, i32) {
    %c0_i32 = arith.constant 0 : i32
    %c0_i32_0 = arith.constant 0 : i32
    %c0_i32_1 = arith.constant 0 : i32
    return %c0_i32, %c0_i32_0 : i32, i32
  }
  func.func @transform_3(%arg0: i32) -> (i32, i32) {
    %c0_i32 = arith.constant 0 : i32
    %c0_i32_0 = arith.constant 0 : i32
    %c0_i32_1 = arith.constant 0 : i32
    return %c0_i32, %c0_i32_0 : i32, i32
  }
  func.func @transform_4(%arg0: i32) -> (i32, i32) {
    %c0_i32 = arith.constant 0 : i32
    %c0_i32_0 = arith.constant 0 : i32
    %c0_i32_1 = arith.constant 0 : i32
    return %c0_i32, %c0_i32_0 : i32, i32
  }
  func.func @transform_5(%arg0: i32) -> (i32, i32) {
    %c0_i32 = arith.constant 0 : i32
    %c0_i32_0 = arith.constant 0 : i32
    %c0_i32_1 = arith.constant 0 : i32
    return %c0_i32, %c0_i32_0 : i32, i32
  }
  func.func @transform_6(%arg0: i32) -> (i32, i32) {
    %c0_i32 = arith.constant 0 : i32
    %c0_i32_0 = arith.constant 0 : i32
    %c0_i32_1 = arith.constant 0 : i32
    return %c0_i32, %c0_i32_0 : i32, i32
  }
  func.func @transform_7(%arg0: i32) -> (i32, i32) {
    %c0_i32 = arith.constant 0 : i32
    %c0_i32_0 = arith.constant 0 : i32
    return %arg0, %c0_i32 : i32, i32
  }
}

</mosaic_0001>

<bundles_post_ra>
// kernel: pg_forward.1
= control target key start
LH: loop header
LB: loop body
LE: loop exit
PB: predicated region body
PF: predicated region fallthrough
CT: control target
= control target key end

     0   :  { %vm40_vm0 = vcmask 1041408   ;;  %v373_v0 = vmov 0.0   ;;  %vm374_vm1 = vmmov 0   ;;  %vm36_vm2 = vcmask 31744   ;;  %s469_s1 = inlined_call_operand.vmem [shape: bf16[4,128], index: 1, kind: input, shape index: {}]   ;;  %s470_s0 = inlined_call_operand.vmem [shape: bf16[8,4], index: 0, kind: input, shape index: {}]   ;;  %s471_s3 = inlined_call_operand.vmem [shape: bf16[128,64], index: 3, kind: input, shape index: {}]   ;;  %s472_s5 = inlined_call_operand.vmem [shape: bf16[64,3], index: 5, kind: input, shape index: {}]   ;;  %s473_s2 = inlined_call_operand.vmem [shape: f32[1,128], index: 2, kind: input, shape index: {}]   ;;  %s474_s4 = inlined_call_operand.vmem [shape: f32[1,64], index: 4, kind: input, shape index: {}]   ;;  %s475_s6 = inlined_call_operand.vmem [shape: f32[1,3], index: 6, kind: input, shape index: {}]   ;;  %s476_s7 = inlined_call_operand.vmem [shape: f32[8,3], index: 7, kind: output, shape index: {}]  }
   0x1   :  { %321 = vmatprep.subr.bf16.mxu0 %v373_v0  ;;  %v28_v1 = vld [vmem:[%s469_s1] sm:$0x3]  ;;  %323 = vmatprep.mubr.msk.bf16.mxu0 %vm374_vm1, %v373_v0  ;;  %v362_v5 = vld [vmem:[%s471_s3 + $0x8] sm:$0xff]   ;;  %v363_v6 = vld [vmem:[%s471_s3 + $0x10] sm:$0xff]   ;;  %vm238_vm3 = vcmask 523264   ;;  %vm282_vm4 = vcmask 23552  }
   0x2   :  { %v42_v2 = vsel %vm40_vm0, %v28_v1, 0  ;;  %327 = vmatprep.subr.bf16.mxu1 %v373_v0  ;;  %v361_v3 = vld [vmem:[%s471_s3] sm:$0xff]   ;;  %343 = vmatprep.mubr.msk.bf16.mxu1 %vm374_vm1, %v373_v0  ;;  %v364_v7 = vld [vmem:[%s471_s3 + $0x18] sm:$0xff]   ;;  %v366_v9 = vld [vmem:[%s471_s3 + $0x28] sm:$0xff]  }
   0x3   :  { %322 = vmatpush3.bf16.msra.mxu0 %v42_v2  ;;  %v27_v4 = vld [vmem:[%s470_s0] sm:$0xf]  ;;  %328 = vmatpush3.bf16.msra.mxu1 %v361_v3  ;;  %v367_v10 = vld [vmem:[%s471_s3 + $0x30] sm:$0xff]   ;;  %v368_v11 = vld [vmem:[%s471_s3 + $0x38] sm:$0xff]  }
   0x4   :  { %347 = vmatprep.subr.bf16.mxu0 %v373_v0  ;;  %329 = vmatprep.subr.bf16.mxu1 %v373_v0  ;;  %v365_v8 = vld [vmem:[%s471_s3 + $0x20] sm:$0xff]   ;;  %v370_v13 = vld [vmem:[%s472_s5 + $0x8] sm:$0xff]   ;;  %v371_v22 = vld [vmem:[%s472_s5 + $0x10] sm:$0xff]  }
   0x5   :  { %v369_v12 = vld [vmem:[%s472_s5] sm:$0xff]   ;;  %v372_v23 = vld [vmem:[%s472_s5 + $0x18] sm:$0xff]  }
   0x6   :  { %324 = vmatmul.mubr.msk.bf16.vlgmr.msra.gmra.mrb[0].mxu0 %vm36_vm2, %v27_v4  ;;  %v288_v14 = vld [vmem:[%s473_s2] ss:$0 sm:$0xff] }
   0x7   :  { %355 = vmatprep.mubr.msk.bf16.mxu0 %vm374_vm1, %v373_v0  ;;  %330 = vmatpush3.bf16.msra.mxu1 %v362_v5  ;;  %v290_v24 = vld [vmem:[%s474_s4] ss:$0 sm:$0xff] }
   0x8   :  { %331 = vmatprep.subr.bf16.mxu1 %v373_v0  ;;  %348 = vmatpush3.bf16.msra.mxu0 %v369_v12  ;;  %v299_v32 = vld [vmem:[%s475_s6] ss:$0 sm:$0xff] }
   0x9   :  { %349 = vmatprep.subr.bf16.mxu0 %v373_v0 }
   0xb   :  { %332 = vmatpush3.bf16.msra.mxu1 %v363_v6 }
   0xc   :  { %333 = vmatprep.subr.bf16.mxu1 %v373_v0  ;;  %350 = vmatpush3.bf16.msra.mxu0 %v370_v13 }
   0xd   :  { %351 = vmatprep.subr.bf16.mxu0 %v373_v0 }
   0xf   :  { %334 = vmatpush3.bf16.msra.mxu1 %v364_v7 }
  0x10   :  { %335 = vmatprep.subr.bf16.mxu1 %v373_v0  ;;  %352 = vmatpush3.bf16.msra.mxu0 %v371_v22 }
  0x11   :  { %353 = vmatprep.subr.bf16.mxu0 %v373_v0 }
  0x13   :  { %336 = vmatpush3.bf16.msra.mxu1 %v365_v8 }
  0x14   :  { %337 = vmatprep.subr.bf16.mxu1 %v373_v0  ;;  %354 = vmatpush3.bf16.msra.mxu0 %v372_v23 }
  0x17   :  { %338 = vmatpush3.bf16.msra.mxu1 %v366_v9 }
  0x18   :  { %339 = vmatprep.subr.bf16.mxu1 %v373_v0 }
  0x1b   :  { %340 = vmatpush3.bf16.msra.mxu1 %v367_v10 }
  0x1c   :  { %341 = vmatprep.subr.bf16.mxu1 %v373_v0 }
  0x1f   :  { %342 = vmatpush3.bf16.msra.mxu1 %v368_v11 }
  0xd9   :  { %v78_v15 = vpop.f32.mrb[0].mxu0 }
  0xda   :  { %v79_v16 = vadd.f32 %v288_v14, %v78_v15  ;;  %v325_v17 = vpop.f32.mrb[1].mxu0 }
  0xdb   :  { %v81_v18 = vpop.f32.mrb[2].mxu0 }
  0xdc   :  { %v84_v19 = vmax.f32 %v79_v16, 0.0  ;;  %v326_v20 = vpop.f32.mrb[3].mxu0 }
  0xde   :  { %v85_v21 = vpack.c.bf16 %v84_v19, %v84_v19 }
  0xe0   :  { %344 = vmatmul.mubr.bf16.vlgmr.msra.gmra.mrb[0].mxu1 %v85_v21 }
 0x1b3   :  { %v191_v25 = vpop.f32.mrb[0].mxu1 }
 0x1b4   :  { %v192_v26 = vadd.f32 %v290_v24, %v191_v25  ;;  %v345_v27 = vpop.f32.mrb[1].mxu1 }
 0x1b5   :  { %v194_v28 = vpop.f32.mrb[2].mxu1 }
 0x1b6   :  { %v197_v29 = vmax.f32 %v192_v26, 0.0  ;;  %v346_v30 = vpop.f32.mrb[3].mxu1 }
 0x1b8   :  { %v198_v31 = vpack.c.bf16 %v197_v29, %v197_v29 }
 0x1ba   :  { %356 = vmatmul.mubr.msk.bf16.vlgmr.msra.gmra.mrb[4].mxu0 %vm238_vm3, %v198_v31 }
 0x28d   :  { %v276_v33 = vpop.f32.mrb[4].mxu0 }
 0x28e   :  { %v277_v34 = vadd.f32 %v299_v32, %v276_v33  ;;  %v357_v35 = vpop.f32.mrb[5].mxu0 }
 0x28f   :  { %v279_v36 = vpop.f32.mrb[6].mxu0 }
 0x290   :  { %283 = vst.msk [vmem:[%s476_s7] sm:$0xff] %vm282_vm4, %v277_v34  ;;  %v358_v37 = vpop.f32.mrb[7].mxu0 }

</bundles_post_ra>
